<compile_context>
chip_gen: v6e
topology: v6e:2x2x1
jax: 0.10.0
libtpu: 0.0.40
codegen_flags: <defaults>
</compile_context>

<pallas_src>
import functools

import jax
import jax.numpy as jnp
from jax.experimental import pallas as pl
from jax.experimental.pallas import tpu as pltpu


def ebt_kernel(
    ctx_ref, out_emb_ref,                  # [bb, E] activation blocks
    w1a_ref, w1b_ref, b1_ref,              # encoder linear 1 (concat folded in)
    g_ref, beta_ref,                       # LayerNorm affine
    w2_ref, b2_ref,                        # encoder linear 2
    wh1_ref, bh1_ref,                      # fused head layer 1  [H, 3*h2]
    wh2_ref, bh2_ref,                      # block-diag head layer 2 [3*h2, 2+A]
    scale_ref,                             # [1, 1] scale_factor (SMEM)
    packed_ref,                            # [bb, OUT_W] packed outputs
    *, num_actions,
):
    A = num_actions

    # ---- encoder layer 1: concat([ctx, out]) @ W1 == ctx@W1a + out@W1b ----
    h = (
        jnp.dot(ctx_ref[...], w1a_ref[...], preferred_element_type=jnp.float32)
        + jnp.dot(out_emb_ref[...], w1b_ref[...], preferred_element_type=jnp.float32)
        + b1_ref[...]
    )
    h = jnp.maximum(h, 0.0)

    # ---- LayerNorm (single-pass stats: var = E[h^2] - mean^2) -------------
    inv_n = 1.0 / h.shape[-1]
    mean = jnp.sum(h, axis=-1, keepdims=True) * inv_n
    mean_sq = jnp.sum(h * h, axis=-1, keepdims=True) * inv_n
    var = mean_sq - mean * mean
    h = (h - mean) * jax.lax.rsqrt(var + 1e-5)
    h = h * g_ref[...] + beta_ref[...]

    # ---- encoder layer 2 ---------------------------------------------------
    zsa = jnp.dot(h, w2_ref[...], preferred_element_type=jnp.float32) + b2_ref[...]

    # ---- fused heads: one matmul -> ReLU -> one block-diag matmul ----------
    t = jnp.dot(zsa, wh1_ref[...], preferred_element_type=jnp.float32) + bh1_ref[...]
    t = jnp.maximum(t, 0.0)
    heads = jnp.dot(t, wh2_ref[...], preferred_element_type=jnp.float32) + bh2_ref[...]

    q = heads[:, 0:1]                      # [bb, 1]
    v = heads[:, 1:2]                      # [bb, 1]
    logits = heads[:, 2:2 + A]             # [bb, A]

    # ---- softmax over actions ----------------------------------------------
    m = jnp.max(logits, axis=-1, keepdims=True)
    e = jnp.exp(logits - m)
    probs = e * pl.reciprocal(jnp.sum(e, axis=-1, keepdims=True), approx=True)

    # ---- sigmoid(scale_factor) scaled score --------------------------------
    sig = 1.0 / (1.0 + jnp.exp(-scale_ref[0, 0]))

    # ---- single lane-dense packed store ------------------------------------
    pad_w = packed_ref.shape[-1] - (4 + 2 * A)
    packed_ref[...] = jnp.concatenate(
        [q, v, q - v, q * sig, logits, probs,
         jnp.zeros((q.shape[0], pad_w), jnp.float32)],
        axis=-1,
    )


def init_params(key, embedding_dim, hidden_dim, num_actions):
    """Deterministic synthetic parameter init (matches module shapes)."""
    h2 = hidden_dim // 2
    keys = jax.random.split(key, 16)

    def lin(kw, kb, fan_in, fan_out):
        bound = 1.0 / jnp.sqrt(fan_in)
        w = jax.random.uniform(kw, (fan_in, fan_out), jnp.float32, -bound, bound)
        b = jax.random.uniform(kb, (1, fan_out), jnp.float32, -bound, bound)
        return w, b

    p = {}
    p["w1"], p["b1"] = lin(keys[0], keys[1], 2 * embedding_dim, hidden_dim)
    p["gamma"] = jnp.ones((1, hidden_dim), jnp.float32)
    p["beta"] = jnp.zeros((1, hidden_dim), jnp.float32)
    p["w2"], p["b2"] = lin(keys[2], keys[3], hidden_dim, hidden_dim)
    p["wq1"], p["bq1"] = lin(keys[4], keys[5], hidden_dim, h2)
    p["wq2"], p["bq2"] = lin(keys[6], keys[7], h2, 1)
    p["wv1"], p["bv1"] = lin(keys[8], keys[9], hidden_dim, h2)
    p["wv2"], p["bv2"] = lin(keys[10], keys[11], h2, 1)
    p["wp1"], p["bp1"] = lin(keys[12], keys[13], hidden_dim, h2)
    p["wp2"], p["bp2"] = lin(keys[14], keys[15], h2, num_actions)
    p["scale_factor"] = jnp.full((1, 1), 10.0, jnp.float32)
    return p


@functools.partial(jax.jit, static_argnames=("num_actions", "block_b"))
def ebt_forward(context_emb, output_emb, params, num_actions=3, block_b=256):
    B, E = context_emb.shape
    h2 = params["wq1"].shape[1]
    A = num_actions
    f32 = jnp.float32

    # Fold the feature-axis concat into the first matmul (split-K).
    w1a = params["w1"][:E]
    w1b = params["w1"][E:]

    # Fuse the three head first layers into one [H, 3*h2] weight.
    wh1 = jnp.concatenate([params["wq1"], params["wv1"], params["wp1"]], axis=1)
    bh1 = jnp.concatenate([params["bq1"], params["bv1"], params["bp1"]], axis=1)

    # Fuse the three head second layers into one block-diagonal [3*h2, 2+A].
    z1 = jnp.zeros((h2, 1), f32)
    zA = jnp.zeros((h2, A), f32)
    wh2 = jnp.concatenate(
        [
            jnp.concatenate([params["wq2"], z1, zA], axis=1),
            jnp.concatenate([z1, params["wv2"], zA], axis=1),
            jnp.concatenate([z1, z1, params["wp2"]], axis=1),
        ],
        axis=0,
    )
    bh2 = jnp.concatenate([params["bq2"], params["bv2"], params["bp2"]], axis=1)

    # Lane-dense packed output layout: [q, v, adv, score, logits(A), probs(A), pad].
    used = 4 + 2 * A
    out_w = 128 * pl.cdiv(used, 128)

    # Batch tiling: full-extent block if small, otherwise 8-aligned tile.
    bb = B if B <= block_b else block_b
    grid = (pl.cdiv(B, bb),)

    act_spec = pl.BlockSpec((bb, E), lambda i: (i, 0))

    def wspec(arr):
        return pl.BlockSpec(arr.shape, lambda i: (0, 0))

    ordered = [
        context_emb, output_emb,
        w1a, w1b, params["b1"],
        params["gamma"], params["beta"],
        params["w2"], params["b2"],
        wh1, bh1, wh2, bh2,
        params["scale_factor"],
    ]

    in_specs = (
        [act_spec, act_spec]
        + [wspec(a) for a in ordered[2:-1]]
        + [pl.BlockSpec((1, 1), lambda i: (0, 0),
                        memory_space=pltpu.MemorySpace.SMEM)]
    )
    out_spec = pl.BlockSpec((bb, out_w), lambda i: (i, 0))

    packed = pl.pallas_call(
        functools.partial(ebt_kernel, num_actions=A),
        out_shape=jax.ShapeDtypeStruct((B, out_w), f32),
        grid=grid,
        in_specs=in_specs,
        out_specs=out_spec,
        compiler_params=pltpu.CompilerParams(
            dimension_semantics=("parallel",),
        ),
    )(*ordered)

    q = packed[:, 0]
    v = packed[:, 1]
    adv = packed[:, 2]
    score = packed[:, 3]
    logits = packed[:, 4:4 + A]
    probs = packed[:, 4 + A:4 + 2 * A]

    # torch `.squeeze()` on [B, 1] -> [B]
    return {
        "q_value": q,
        "state_value": v,
        "action_logits": logits,
        "action_probs": probs,
        "advantage": adv,
        "score": score,
    }


def ebt_reference(context_emb, output_emb, p):
    """Plain-JAX reference for verification."""
    x = jnp.concatenate([context_emb, output_emb], axis=-1)
    h = jnp.maximum(x @ p["w1"] + p["b1"], 0.0)
    mean = h.mean(-1, keepdims=True)
    var = ((h - mean) ** 2).mean(-1, keepdims=True)
    h = (h - mean) / jnp.sqrt(var + 1e-5) * p["gamma"] + p["beta"]
    zsa = h @ p["w2"] + p["b2"]

    def head(wa, ba, wb, bb):
        return jnp.maximum(zsa @ wa + ba, 0.0) @ wb + bb

    q = head(p["wq1"], p["bq1"], p["wq2"], p["bq2"]).squeeze(-1)
    v = head(p["wv1"], p["bv1"], p["wv2"], p["bv2"]).squeeze(-1)
    logits = head(p["wp1"], p["bp1"], p["wp2"], p["bp2"])
    probs = jax.nn.softmax(logits, axis=-1)
    sig = jax.nn.sigmoid(p["scale_factor"][0, 0])
    return {
        "q_value": q,
        "state_value": v,
        "action_logits": logits,
        "action_probs": probs,
        "advantage": q - v,
        "score": q * sig,
    }


if __name__ == "__main__":
    # Small shapes consistent with the module's forward pass.
    B, E, H, A = 16, 32, 32, 3

    key = jax.random.PRNGKey(0)
    k_ctx, k_out, k_params = jax.random.split(key, 3)
    context_emb = jax.random.normal(k_ctx, (B, E), jnp.float32)
    output_emb = jax.random.normal(k_out, (B, E), jnp.float32)
    params = init_params(k_params, embedding_dim=E, hidden_dim=H, num_actions=A)

    # block_b=8 exercises the batch grid (2 pipelined / parallel grid steps).
    out = ebt_forward(context_emb, output_emb, params, num_actions=A, block_b=8)
    out = jax.block_until_ready(out)

    ref = ebt_reference(context_emb, output_emb, params)
    for name in out:
        assert out[name].shape == ref[name].shape, (name, out[name].shape, ref[name].shape)
        # approx=True reciprocal in the in-kernel softmax -> slightly looser tol.
        assert jnp.allclose(out[name], ref[name], atol=2e-3, rtol=2e-3), name

    print("KERNEL_OK")
</pallas_src>

<mosaic_0001>
module attributes {stable_mosaic.version = 11 : i64} {
  func.func @ebt_kernel(%arg0: i32, %arg1: memref<8x32xf32, #tpu.memory_space<vmem>>, %arg2: memref<8x32xf32, #tpu.memory_space<vmem>>, %arg3: memref<32x32xf32, #tpu.memory_space<vmem>>, %arg4: memref<32x32xf32, #tpu.memory_space<vmem>>, %arg5: memref<1x32xf32, #tpu.memory_space<vmem>>, %arg6: memref<1x32xf32, #tpu.memory_space<vmem>>, %arg7: memref<1x32xf32, #tpu.memory_space<vmem>>, %arg8: memref<32x32xf32, #tpu.memory_space<vmem>>, %arg9: memref<1x32xf32, #tpu.memory_space<vmem>>, %arg10: memref<32x48xf32, #tpu.memory_space<vmem>>, %arg11: memref<1x48xf32, #tpu.memory_space<vmem>>, %arg12: memref<48x5xf32, #tpu.memory_space<vmem>>, %arg13: memref<1x5xf32, #tpu.memory_space<vmem>>, %arg14: memref<1x1xf32, #tpu.memory_space<smem>>, %arg15: memref<8x128xf32, #tpu.memory_space<vmem>>) attributes {dimension_semantics = [#tpu.dimension_semantics<parallel>], iteration_bounds = array<i64: 2>, scalar_prefetch = 0 : i64, scratch_operands = 0 : i64, tpu.core_type = #tpu.core_type<tc>, window_params = [{transform_indices = @transform_0, window_bounds = array<i64: 8, 32>}, {transform_indices = @transform_1, window_bounds = array<i64: 8, 32>}, {pipeline_mode = #tpu.pipeline_mode<synchronous>, transform_indices = @transform_2, window_bounds = array<i64: 32, 32>}, {pipeline_mode = #tpu.pipeline_mode<synchronous>, transform_indices = @transform_3, window_bounds = array<i64: 32, 32>}, {pipeline_mode = #tpu.pipeline_mode<synchronous>, transform_indices = @transform_4, window_bounds = array<i64: 1, 32>}, {pipeline_mode = #tpu.pipeline_mode<synchronous>, transform_indices = @transform_5, window_bounds = array<i64: 1, 32>}, {pipeline_mode = #tpu.pipeline_mode<synchronous>, transform_indices = @transform_6, window_bounds = array<i64: 1, 32>}, {pipeline_mode = #tpu.pipeline_mode<synchronous>, transform_indices = @transform_7, window_bounds = array<i64: 32, 32>}, {pipeline_mode = #tpu.pipeline_mode<synchronous>, transform_indices = @transform_8, window_bounds = array<i64: 1, 32>}, {pipeline_mode = #tpu.pipeline_mode<synchronous>, transform_indices = @transform_9, window_bounds = array<i64: 32, 48>}, {pipeline_mode = #tpu.pipeline_mode<synchronous>, transform_indices = @transform_10, window_bounds = array<i64: 1, 48>}, {pipeline_mode = #tpu.pipeline_mode<synchronous>, transform_indices = @transform_11, window_bounds = array<i64: 48, 5>}, {pipeline_mode = #tpu.pipeline_mode<synchronous>, transform_indices = @transform_12, window_bounds = array<i64: 1, 5>}, {transform_indices = @transform_13, window_bounds = array<i64: 1, 1>}, {transform_indices = @transform_14, window_bounds = array<i64: 8, 128>}]} {
    %c0 = arith.constant 0 : index
    %c0_0 = arith.constant 0 : index
    %0 = vector.load %arg1[%c0, %c0_0] : memref<8x32xf32, #tpu.memory_space<vmem>>, vector<8x32xf32>
    %c0_1 = arith.constant 0 : index
    %c0_2 = arith.constant 0 : index
    %1 = vector.load %arg3[%c0_1, %c0_2] : memref<32x32xf32, #tpu.memory_space<vmem>>, vector<32x32xf32>
    %cst = arith.constant dense<0.000000e+00> : vector<8x32xf32>
    %2 = tpu.matmul %0, %1, %cst {dimension_numbers = #tpu.dot_dimension_numbers<[1], [0], [0], [1], [0, 0, 1, 1], [], []>} : vector<8x32xf32>, vector<32x32xf32>, vector<8x32xf32> -> vector<8x32xf32>
    %c0_3 = arith.constant 0 : index
    %c0_4 = arith.constant 0 : index
    %3 = vector.load %arg2[%c0_3, %c0_4] : memref<8x32xf32, #tpu.memory_space<vmem>>, vector<8x32xf32>
    %c0_5 = arith.constant 0 : index
    %c0_6 = arith.constant 0 : index
    %4 = vector.load %arg4[%c0_5, %c0_6] : memref<32x32xf32, #tpu.memory_space<vmem>>, vector<32x32xf32>
    %cst_7 = arith.constant dense<0.000000e+00> : vector<8x32xf32>
    %5 = tpu.matmul %3, %4, %cst_7 {dimension_numbers = #tpu.dot_dimension_numbers<[1], [0], [0], [1], [0, 0, 1, 1], [], []>} : vector<8x32xf32>, vector<32x32xf32>, vector<8x32xf32> -> vector<8x32xf32>
    %6 = arith.addf %2, %5 : vector<8x32xf32>
    %c0_8 = arith.constant 0 : index
    %c0_9 = arith.constant 0 : index
    %7 = vector.load %arg5[%c0_8, %c0_9] : memref<1x32xf32, #tpu.memory_space<vmem>>, vector<1x32xf32>
    %8 = vector.broadcast %7 : vector<1x32xf32> to vector<8x32xf32>
    %9 = arith.addf %6, %8 : vector<8x32xf32>
    %cst_10 = arith.constant 0.000000e+00 : f32
    %10 = vector.broadcast %cst_10 : f32 to vector<8x32xf32>
    %11 = arith.maximumf %9, %10 : vector<8x32xf32>
    %cst_11 = arith.constant dense<0.000000e+00> : vector<8xf32>
    %12 = vector.multi_reduction <add>, %11, %cst_11 [1] : vector<8x32xf32> to vector<8xf32>
    %13 = vector.shape_cast %12 : vector<8xf32> to vector<8x1xf32>
    %cst_12 = arith.constant 3.125000e-02 : f32
    %14 = vector.broadcast %cst_12 : f32 to vector<8x1xf32>
    %15 = arith.mulf %13, %14 : vector<8x1xf32>
    %16 = arith.mulf %11, %11 : vector<8x32xf32>
    %cst_13 = arith.constant dense<0.000000e+00> : vector<8xf32>
    %17 = vector.multi_reduction <add>, %16, %cst_13 [1] : vector<8x32xf32> to vector<8xf32>
    %18 = vector.shape_cast %17 : vector<8xf32> to vector<8x1xf32>
    %cst_14 = arith.constant 3.125000e-02 : f32
    %19 = vector.broadcast %cst_14 : f32 to vector<8x1xf32>
    %20 = arith.mulf %18, %19 : vector<8x1xf32>
    %21 = arith.mulf %15, %15 : vector<8x1xf32>
    %22 = arith.subf %20, %21 : vector<8x1xf32>
    %23 = vector.broadcast %15 : vector<8x1xf32> to vector<8x32xf32>
    %24 = arith.subf %11, %23 : vector<8x32xf32>
    %cst_15 = arith.constant 9.99999974E-6 : f32
    %25 = vector.broadcast %cst_15 : f32 to vector<8x1xf32>
    %26 = arith.addf %22, %25 : vector<8x1xf32>
    %27 = math.rsqrt %26 : vector<8x1xf32>
    %28 = vector.broadcast %27 : vector<8x1xf32> to vector<8x32xf32>
    %29 = arith.mulf %24, %28 : vector<8x32xf32>
    %c0_16 = arith.constant 0 : index
    %c0_17 = arith.constant 0 : index
    %30 = vector.load %arg6[%c0_16, %c0_17] : memref<1x32xf32, #tpu.memory_space<vmem>>, vector<1x32xf32>
    %31 = vector.broadcast %30 : vector<1x32xf32> to vector<8x32xf32>
    %32 = arith.mulf %29, %31 : vector<8x32xf32>
    %c0_18 = arith.constant 0 : index
    %c0_19 = arith.constant 0 : index
    %33 = vector.load %arg7[%c0_18, %c0_19] : memref<1x32xf32, #tpu.memory_space<vmem>>, vector<1x32xf32>
    %34 = vector.broadcast %33 : vector<1x32xf32> to vector<8x32xf32>
    %35 = arith.addf %32, %34 : vector<8x32xf32>
    %c0_20 = arith.constant 0 : index
    %c0_21 = arith.constant 0 : index
    %36 = vector.load %arg8[%c0_20, %c0_21] : memref<32x32xf32, #tpu.memory_space<vmem>>, vector<32x32xf32>
    %cst_22 = arith.constant dense<0.000000e+00> : vector<8x32xf32>
    %37 = tpu.matmul %35, %36, %cst_22 {dimension_numbers = #tpu.dot_dimension_numbers<[1], [0], [0], [1], [0, 0, 1, 1], [], []>} : vector<8x32xf32>, vector<32x32xf32>, vector<8x32xf32> -> vector<8x32xf32>
    %c0_23 = arith.constant 0 : index
    %c0_24 = arith.constant 0 : index
    %38 = vector.load %arg9[%c0_23, %c0_24] : memref<1x32xf32, #tpu.memory_space<vmem>>, vector<1x32xf32>
    %39 = vector.broadcast %38 : vector<1x32xf32> to vector<8x32xf32>
    %40 = arith.addf %37, %39 : vector<8x32xf32>
    %c0_25 = arith.constant 0 : index
    %c0_26 = arith.constant 0 : index
    %41 = vector.load %arg10[%c0_25, %c0_26] : memref<32x48xf32, #tpu.memory_space<vmem>>, vector<32x48xf32>
    %cst_27 = arith.constant dense<0.000000e+00> : vector<8x48xf32>
    %42 = tpu.matmul %40, %41, %cst_27 {dimension_numbers = #tpu.dot_dimension_numbers<[1], [0], [0], [1], [0, 0, 1, 1], [], []>} : vector<8x32xf32>, vector<32x48xf32>, vector<8x48xf32> -> vector<8x48xf32>
    %c0_28 = arith.constant 0 : index
    %c0_29 = arith.constant 0 : index
    %43 = vector.load %arg11[%c0_28, %c0_29] : memref<1x48xf32, #tpu.memory_space<vmem>>, vector<1x48xf32>
    %44 = vector.broadcast %43 : vector<1x48xf32> to vector<8x48xf32>
    %45 = arith.addf %42, %44 : vector<8x48xf32>
    %cst_30 = arith.constant 0.000000e+00 : f32
    %46 = vector.broadcast %cst_30 : f32 to vector<8x48xf32>
    %47 = arith.maximumf %45, %46 : vector<8x48xf32>
    %c0_31 = arith.constant 0 : index
    %c0_32 = arith.constant 0 : index
    %48 = vector.load %arg12[%c0_31, %c0_32] : memref<48x5xf32, #tpu.memory_space<vmem>>, vector<48x5xf32>
    %cst_33 = arith.constant dense<0.000000e+00> : vector<8x5xf32>
    %49 = tpu.matmul %47, %48, %cst_33 {dimension_numbers = #tpu.dot_dimension_numbers<[1], [0], [0], [1], [0, 0, 1, 1], [], []>} : vector<8x48xf32>, vector<48x5xf32>, vector<8x5xf32> -> vector<8x5xf32>
    %c0_34 = arith.constant 0 : index
    %c0_35 = arith.constant 0 : index
    %50 = vector.load %arg13[%c0_34, %c0_35] : memref<1x5xf32, #tpu.memory_space<vmem>>, vector<1x5xf32>
    %51 = vector.broadcast %50 : vector<1x5xf32> to vector<8x5xf32>
    %52 = arith.addf %49, %51 : vector<8x5xf32>
    %53 = vector.extract_strided_slice %52 {offsets = [0, 0], sizes = [8, 1], strides = [1, 1]} : vector<8x5xf32> to vector<8x1xf32>
    %54 = vector.extract_strided_slice %52 {offsets = [0, 1], sizes = [8, 1], strides = [1, 1]} : vector<8x5xf32> to vector<8x1xf32>
    %55 = vector.extract_strided_slice %52 {offsets = [0, 2], sizes = [8, 3], strides = [1, 1]} : vector<8x5xf32> to vector<8x3xf32>
    %cst_36 = arith.constant dense<0xFF800000> : vector<8xf32>
    %56 = vector.multi_reduction <maximumf>, %55, %cst_36 [1] : vector<8x3xf32> to vector<8xf32>
    %57 = vector.shape_cast %56 : vector<8xf32> to vector<8x1xf32>
    %58 = vector.broadcast %57 : vector<8x1xf32> to vector<8x3xf32>
    %59 = arith.subf %55, %58 : vector<8x3xf32>
    %60 = math.exp %59 : vector<8x3xf32>
    %cst_37 = arith.constant dense<0.000000e+00> : vector<8xf32>
    %61 = vector.multi_reduction <add>, %60, %cst_37 [1] : vector<8x3xf32> to vector<8xf32>
    %62 = vector.shape_cast %61 : vector<8xf32> to vector<8x1xf32>
    %63 = tpu.reciprocal %62 {approx = true} : vector<8x1xf32> -> vector<8x1xf32>
    %64 = vector.broadcast %63 : vector<8x1xf32> to vector<8x3xf32>
    %65 = arith.mulf %60, %64 : vector<8x3xf32>
    %c0_38 = arith.constant 0 : index
    %c0_39 = arith.constant 0 : index
    %66 = memref.load %arg14[%c0_38, %c0_39] : memref<1x1xf32, #tpu.memory_space<smem>>
    %cst_40 = arith.constant 0.000000e+00 : f32
    %67 = arith.subf %cst_40, %66 : f32
    %68 = math.exp %67 : f32
    %cst_41 = arith.constant 1.000000e+00 : f32
    %69 = arith.addf %cst_41, %68 : f32
    %cst_42 = arith.constant 1.000000e+00 : f32
    %70 = arith.divf %cst_42, %69 : f32
    %71 = arith.subf %53, %54 : vector<8x1xf32>
    %72 = vector.broadcast %70 : f32 to vector<8x1xf32>
    %73 = arith.mulf %53, %72 : vector<8x1xf32>
    %cst_43 = arith.constant 0.000000e+00 : f32
    %74 = vector.broadcast %cst_43 : f32 to vector<8x118xf32>
    %75 = tpu.concatenate %53, %54, %71, %73, %55, %65, %74 in 1 : vector<8x1xf32>, vector<8x1xf32>, vector<8x1xf32>, vector<8x1xf32>, vector<8x3xf32>, vector<8x3xf32>, vector<8x118xf32> -> vector<8x128xf32>
    %c0_44 = arith.constant 0 : index
    %c0_45 = arith.constant 0 : index
    %76 = vector.load %arg15[%c0_44, %c0_45] : memref<8x128xf32, #tpu.memory_space<vmem>>, vector<8x128xf32>
    tpu.vector_store %arg15[%c0_44, %c0_45], %75 {strides = array<i32>} : memref<8x128xf32, #tpu.memory_space<vmem>>, vector<8x128xf32>,
    return
  }
  func.func @transform_0(%arg0: i32) -> (i32, i32) {
    %c0_i32 = arith.constant 0 : i32
    %c0_i32_0 = arith.constant 0 : i32
    return %arg0, %c0_i32 : i32, i32
  }
  func.func @transform_1(%arg0: i32) -> (i32, i32) {
    %c0_i32 = arith.constant 0 : i32
    %c0_i32_0 = arith.constant 0 : i32
    return %arg0, %c0_i32 : i32, i32
  }
  func.func @transform_2(%arg0: i32) -> (i32, i32) {
    %c0_i32 = arith.constant 0 : i32
    %c0_i32_0 = arith.constant 0 : i32
    %c0_i32_1 = arith.constant 0 : i32
    return %c0_i32, %c0_i32_0 : i32, i32
  }
  func.func @transform_3(%arg0: i32) -> (i32, i32) {
    %c0_i32 = arith.constant 0 : i32
    %c0_i32_0 = arith.constant 0 : i32
    %c0_i32_1 = arith.constant 0 : i32
    return %c0_i32, %c0_i32_0 : i32, i32
  }
  func.func @transform_4(%arg0: i32) -> (i32, i32) {
    %c0_i32 = arith.constant 0 : i32
    %c0_i32_0 = arith.constant 0 : i32
    %c0_i32_1 = arith.constant 0 : i32
    return %c0_i32, %c0_i32_0 : i32, i32
  }
  func.func @transform_5(%arg0: i32) -> (i32, i32) {
    %c0_i32 = arith.constant 0 : i32
    %c0_i32_0 = arith.constant 0 : i32
    %c0_i32_1 = arith.constant 0 : i32
    return %c0_i32, %c0_i32_0 : i32, i32
  }
  func.func @transform_6(%arg0: i32) -> (i32, i32) {
    %c0_i32 = arith.constant 0 : i32
    %c0_i32_0 = arith.constant 0 : i32
    %c0_i32_1 = arith.constant 0 : i32
    return %c0_i32, %c0_i32_0 : i32, i32
  }
  func.func @transform_7(%arg0: i32) -> (i32, i32) {
    %c0_i32 = arith.constant 0 : i32
    %c0_i32_0 = arith.constant 0 : i32
    %c0_i32_1 = arith.constant 0 : i32
    return %c0_i32, %c0_i32_0 : i32, i32
  }
  func.func @transform_8(%arg0: i32) -> (i32, i32) {
    %c0_i32 = arith.constant 0 : i32
    %c0_i32_0 = arith.constant 0 : i32
    %c0_i32_1 = arith.constant 0 : i32
    return %c0_i32, %c0_i32_0 : i32, i32
  }
  func.func @transform_9(%arg0: i32) -> (i32, i32) {
    %c0_i32 = arith.constant 0 : i32
    %c0_i32_0 = arith.constant 0 : i32
    %c0_i32_1 = arith.constant 0 : i32
    return %c0_i32, %c0_i32_0 : i32, i32
  }
  func.func @transform_10(%arg0: i32) -> (i32, i32) {
    %c0_i32 = arith.constant 0 : i32
    %c0_i32_0 = arith.constant 0 : i32
    %c0_i32_1 = arith.constant 0 : i32
    return %c0_i32, %c0_i32_0 : i32, i32
  }
  func.func @transform_11(%arg0: i32) -> (i32, i32) {
    %c0_i32 = arith.constant 0 : i32
    %c0_i32_0 = arith.constant 0 : i32
    %c0_i32_1 = arith.constant 0 : i32
    return %c0_i32, %c0_i32_0 : i32, i32
  }
  func.func @transform_12(%arg0: i32) -> (i32, i32) {
    %c0_i32 = arith.constant 0 : i32
    %c0_i32_0 = arith.constant 0 : i32
    %c0_i32_1 = arith.constant 0 : i32
    return %c0_i32, %c0_i32_0 : i32, i32
  }
  func.func @transform_13(%arg0: i32) -> (i32, i32) {
    %c0_i32 = arith.constant 0 : i32
    %c0_i32_0 = arith.constant 0 : i32
    %c0_i32_1 = arith.constant 0 : i32
    return %c0_i32, %c0_i32_0 : i32, i32
  }
  func.func @transform_14(%arg0: i32) -> (i32, i32) {
    %c0_i32 = arith.constant 0 : i32
    %c0_i32_0 = arith.constant 0 : i32
    return %arg0, %c0_i32 : i32, i32
  }
}

</mosaic_0001>

<bundles_post_ra>
// kernel: ebt_forward.1
= control target key start
LH: loop header
LB: loop body
LE: loop exit
PB: predicated region body
PF: predicated region fallthrough
CT: control target
= control target key end

     0   :  { %s1287_s15 = smov 0   ;;  %s1436_s0 = inlined_call_operand.vmem [shape: f32[16,32], index: 0, kind: input, shape index: {}]   ;;  %s1437_s1 = inlined_call_operand.vmem [shape: f32[16,32], index: 1, kind: input, shape index: {}]   ;;  %s1438_s2 = inlined_call_operand.vmem [shape: f32[32,32], index: 2, kind: input, shape index: {}]   ;;  %s1439_s3 = inlined_call_operand.vmem [shape: f32[32,32], index: 3, kind: input, shape index: {}]   ;;  %s1440_s4 = inlined_call_operand.vmem [shape: f32[1,32], index: 4, kind: input, shape index: {}]   ;;  %s1441_s5 = inlined_call_operand.vmem [shape: f32[1,32], index: 5, kind: input, shape index: {}]   ;;  %s1442_s6 = inlined_call_operand.vmem [shape: f32[1,32], index: 6, kind: input, shape index: {}]   ;;  %s1443_s7 = inlined_call_operand.vmem [shape: f32[32,32], index: 7, kind: input, shape index: {}]   ;;  %s1444_s8 = inlined_call_operand.vmem [shape: f32[1,32], index: 8, kind: input, shape index: {}]   ;;  %s1445_s9 = inlined_call_operand.vmem [shape: f32[32,48], index: 9, kind: input, shape index: {}]   ;;  %s1446_s10 = inlined_call_operand.vmem [shape: f32[1,48], index: 10, kind: input, shape index: {}]   ;;  %s1447_s11 = inlined_call_operand.vmem [shape: f32[48,5], index: 11, kind: input, shape index: {}]   ;;  %s1448_s12 = inlined_call_operand.vmem [shape: f32[1,5], index: 12, kind: input, shape index: {}]   ;;  %s1449_s13 = inlined_call_operand.<no memory space> [shape: f32[1,1], index: 13, kind: input, shape index: {}]   ;;  %s1450_s14 = inlined_call_operand.vmem [shape: f32[16,128], index: 14, kind: output, shape index: {}]  }
   0x1   :  { %19 = sst [smem:[#allocation2]] %s1449_s13 }
   0x2 LB: > { %s1058_s16 = sadd.s32 4294967295, %s1200_s15   ;;  %p1062_p0 = scmp.ge.s32.totalorder %s1200_s15, 1  ;;  %s1200_s15 = sphi %s1287_s15, %s25_s15  }
   0x3   : > { %p421_p1 = scmp.lt.s32.totalorder %s1200_s15, 3 }
   0x5   : > { %p422_p2 = pnand %p1062_p0, %p421_p1 }
   0x6   : > { %p469_p3 = scmp.lt.s32.totalorder (!%p422_p2), %s1058_s16, 1  ;;  %s951_s30 = sld [smem:[#allocation2]] (!%p422_p2) }
   0x7   : > { %425 = sbr.rel (%p422_p2) target bundleno = 1531 (0x5fb), region = 76  ;;  %s1204_s23 = smov (!%p422_p2), 126  }
   0x8   : > { %s1205_s24 = smov (!%p422_p2), 127   ;;  %s1206_s26 = smov (!%p422_p2), 2  }
   0x9   : > { %s1208_s28 = smov (!%p422_p2), 5  }
   0xc   : > { %v490_v0 = vld [vmem:[%s1439_s3 + $0x18] sm:$0xff]  ;;  %v1202_v1 = vmov 0.0   ;;  %v489_v2 = vld [vmem:[%s1439_s3 + $0x10] sm:$0xff]  ;;  %vm1203_vm0 = vmmov 0   ;;  %s1452_s16 = smov (!%p469_p3, %s1058_s16), 1  ;;  %v488_v3 = vld [vmem:[%s1439_s3 + $0x8] sm:$0xff] }
   0xd   : > { %1106 = vmatprep.subr.mxu1 %v1202_v1  ;;  %1114 = vmatprep.mubr.msk.f32.mxu1 %vm1203_vm0, %v1202_v1  ;;  %s1311_s22 = sshll.u32 %s1452_s16, 3  ;;  %v487_v4 = vld [vmem:[%s1439_s3] sm:$0xff]  ;;  %vm491_vm1 = vcmask 261120   ;;  %v485_v6 = vld [vmem:[%s1438_s2 + $0x18] sm:$0xff]  ;;  %v484_v7 = vld [vmem:[%s1438_s2 + $0x10] sm:$0xff]  ;;  %s952_s16 = ssub.f32 0.0, %s951_s30 }
   0xe   : > { %1107 = vmatpush3.msra.mxu1 %v490_v0  ;;  %1128 = vmatprep.subr.mxu0 %v1202_v1  ;;  %s476_s27 = scalar_lea.vmem %s1437_s1, %s1311_s22  ;;  %v483_v8 = vld [vmem:[%s1438_s2 + $0x8] sm:$0xff]  ;;  %s472_s20 = scalar_lea.vmem %s1436_s0, %s1311_s22  ;;  %v482_v9 = vld [vmem:[%s1438_s2] sm:$0xff]  ;;  %v681_v22 = vld [vmem:[%s1443_s7 + $0x18] sm:$0xff]  ;;  %vm860_vm2 = vcmask 392192   ;;  %vm934_vm3 = vcmask 39952   ;;  %vm945_vm4 = vcmask 23552  }
   0xf   : > { %1108 = vmatprep.subr.mxu1 %v1202_v1  ;;  %1136 = vmatprep.mubr.msk.f32.mxu0 %vm1203_vm0, %v1202_v1  ;;  %v486_v5 = vld [vmem:[%s476_s27] sm:$0xff]  ;;  %v680_v23 = vld [vmem:[%s1443_s7 + $0x10] sm:$0xff]  ;;  %v679_v24 = vld [vmem:[%s1443_s7 + $0x8] sm:$0xff]  ;;  %v953_v54 = vstv %s952_s16  ;;  %s1207_s27 = smov 3   ;;  %vm983_vm5 = vcmask 15360   ;;  %vm986_vm6 = vcmask 31744   ;;  %s480_s16 = scalar_lea.vmem %s1450_s14, %s1311_s22 }
  0x10   : > { %1109 = vmatpush3.msra.mxu1 %v489_v2  ;;  %v481_v10 = vld [vmem:[%s472_s20] sm:$0xff]  ;;  %1129 = vmatpush3.msra.mxu0 %v681_v22  ;;  %v765_v26 = vld [vmem:[%s1445_s9 + $0x18] sm:$0xff]  ;;  %v764_v27 = vld [vmem:[%s1445_s9 + $0x10] sm:$0xff]  ;;  %v954_v55 = vmul.f32 1.442695, %v953_v54  ;;  %vm988_vm7 = vcmask 56320  }
  0x11   : > { %1110 = vmatprep.subr.mxu1 %v1202_v1  ;;  %v1068_v14 = vld [vmem:[%s1440_s4] ss:$0 sm:$0xff]  ;;  %1130 = vmatprep.subr.mxu0 %v1202_v1  ;;  %v763_v42 = vld [vmem:[%s1445_s9 + $0x8] sm:$0xff]  ;;  %v850_v46 = vld [vmem:[%s1447_s11 + $0x18] sm:$0xff]  ;;  %vm990_vm8 = vcmask 80896  }
  0x12   : > { %1111 = vmatpush3.msra.mxu1 %v488_v3  ;;  %1131 = vmatpush3.msra.mxu0 %v680_v23  ;;  %v678_v25 = vld [vmem:[%s1443_s7] sm:$0xff]  ;;  %v852_v44 = vld [vmem:[%s1447_s11 + $0x28] sm:$0xff]  ;;  %v849_v51 = vld [vmem:[%s1447_s11 + $0x10] sm:$0xff] }
  0x13   : > { %1112 = vmatprep.subr.mxu1 %v1202_v1  ;;  %1132 = vmatprep.subr.mxu0 %v1202_v1  ;;  %v1069_v37 = vld [vmem:[%s1441_s5] ss:$0 sm:$0xff]  ;;  %v848_v52 = vld [vmem:[%s1447_s11 + $0x8] sm:$0xff] }
  0x14   : > { %1113 = vmatpush3.msra.mxu1 %v487_v4  ;;  %1133 = vmatpush3.msra.mxu0 %v679_v24  ;;  %v1070_v39 = vld [vmem:[%s1442_s6] ss:$0 sm:$0xff] }
  0x15   : > { %1115 = vmatmul.mubr.msk.f32.vlgmr.msra.gmra.mxu1 %vm491_vm1, %v486_v5  ;;  %1117 = vmatprep.subr.mxu1 %v1202_v1  ;;  %v762_v43 = vld [vmem:[%s1445_s9] sm:$0xff] }
  0x16   : > { %1118 = vmatpush3.msra.mxu1 %v485_v6  ;;  %1125 = vmatprep.mubr.msk.f32.mxu1 %vm1203_vm0, %v1202_v1  ;;  %v851_v45 = vld [vmem:[%s1447_s11 + $0x20] sm:$0xff] }
  0x17   : > { %1119 = vmatprep.subr.mxu1 %v1202_v1  ;;  %1134 = vmatprep.subr.mxu0 %v1202_v1  ;;  %v1071_v47 = vld [vmem:[%s1444_s8] ss:$0 sm:$0xff] }
  0x18   : > { %1120 = vmatpush3.msra.mxu1 %v484_v7  ;;  %1135 = vmatpush3.msra.mxu0 %v678_v25  ;;  %v847_v53 = vld [vmem:[%s1447_s11] sm:$0xff] }
  0x19   : > { %1121 = vmatprep.subr.mxu1 %v1202_v1  ;;  %1150 = vmatprep.subr.mxu0 %v1202_v1  ;;  %v1073_v59 = vld [vmem:[%s1446_s10] ss:$0 sm:$0xff] }
  0x1a   : > { %1122 = vmatpush3.msra.mxu1 %v483_v8  ;;  %v1075_v0 = vld [vmem:[%s1448_s12] ss:$0 sm:$0xff] }
  0x1b   : > { %1123 = vmatprep.subr.mxu1 %v1202_v1 }
  0x1c   : > { %1124 = vmatpush3.msra.mxu1 %v482_v9 }
  0x1d   : > { %1126 = vmatmul.mubr.msk.f32.vlgmr.msra.gmra.mxu1 %vm491_vm1, %v481_v10  ;;  %1139 = vmatprep.subr.mxu1 %v1202_v1 }
  0x1e   : > { %1147 = vmatprep.mubr.msk.f32.mxu1 %vm1203_vm0, %v1202_v1  ;;  %1140 = vmatpush3.msra.mxu1 %v765_v26 }
  0x1f   : > { %1141 = vmatprep.subr.mxu1 %v1202_v1 }
  0x20   : > { %1142 = vmatpush3.msra.mxu1 %v764_v27 }
  0x21   : > { %1143 = vmatprep.subr.mxu1 %v1202_v1 }
  0x22   : > { %1144 = vmatpush3.msra.mxu1 %v763_v42 }
  0x23   : > { %1145 = vmatprep.subr.mxu1 %v1202_v1 }
  0x24   : > { %1146 = vmatpush3.msra.mxu1 %v762_v43 }
  0xd5   : > { %v561_v11 = vpop.f32.mrf.mxu1 }
  0xd7   : > { %v1116_v12 = vpop.f32.mrf.mxu1 }
  0xdd   : > { %v634_v13 = vpop.f32.mrf.mxu1 }
  0xde   : > { %v635_v15 = vadd.f32 %v634_v13, %v561_v11 }
  0xdf   : > { %v1127_v16 = vpop.f32.mrf.mxu1 }
  0xe0   : > { %v645_v17 = vadd.f32 %v1068_v14, %v635_v15 }
  0xe2   : > { %v646_v18 = vmax.f32 %v645_v17, 0.0 }
  0xe4   : > { %v647_v19 = vsel %vm491_vm1, %v646_v18, 0.0  ;;  %v651_v20 = vmul.f32 %v646_v18, %v646_v18 }
  0xe5   : > { %648 = vadd.xlane.f32.xlu0 %v647_v19 }
  0xe6   : > { %v652_v21 = vsel %vm491_vm1, %v651_v20, 0.0 }
  0xe9   : > { %653 = vadd.xlane.f32.xlu0 %v652_v21 }
 0x16e   : > { %v649_v28 = vpop.xlane.xlu0 %648 }
 0x16f   : > { %v650_v29 = vmul.f32 0.03125, %v649_v28 }
 0x171   : > { %v656_v31 = vmul.f32 %v650_v29, %v650_v29  ;;  %v658_v35 = vsub.f32 %v646_v18, %v650_v29 }
 0x172   : > { %v654_v30 = vpop.xlane.xlu0 %653 }
 0x173   : > { %v655_v32 = vmul.f32 0.03125, %v654_v30 }
 0x175   : > { %v657_v33 = vsub.f32 %v655_v32, %v656_v31 }
 0x177   : > { %v659_v34 = vadd.f32 1e-05, %v657_v33 }
 0x179   : > { %1184 = vrsqrt.f32 %v659_v34 }
 0x17a   : > { %1186 = vpow2.f32 %v954_v55 }
 0x186   : > { %v1185_v36 = vpop.eup %1184 }
 0x187   : > { %v661_v38 = vmul.f32 %v1185_v36, %v658_v35  ;;  %v1187_v56 = vpop.eup %1186 }
 0x188   : > { %1165 = vpush %v1187_v56 }
 0x189   : > { %v669_v40 = vmul.f32 %v1069_v37, %v661_v38 }
 0x18b   : > { %v677_v41 = vadd.f32 %v1070_v39, %v669_v40 }
 0x18d   : > { %1137 = vmatmul.mubr.msk.f32.vlgmr.msra.gmra.mxu0 %vm491_vm1, %v677_v41 }
 0x18e   : > { %1162 = vmatprep.mubr.msk.f32.mxu0 %vm1203_vm0, %v1202_v1  ;;  %1151 = vmatpush3.msra.mxu0 %v852_v44 }
 0x18f   : > { %1152 = vmatprep.subr.mxu0 %v1202_v1 }
 0x190   : > { %1153 = vmatpush3.msra.mxu0 %v851_v45 }
 0x191   : > { %1154 = vmatprep.subr.mxu0 %v1202_v1 }
 0x192   : > { %1155 = vmatpush3.msra.mxu0 %v850_v46 }
 0x193   : > { %1156 = vmatprep.subr.mxu0 %v1202_v1 }
 0x194   : > { %1157 = vmatpush3.msra.mxu0 %v849_v51 }
 0x195   : > { %1158 = vmatprep.subr.mxu0 %v1202_v1 }
 0x196   : > { %1159 = vmatpush3.msra.mxu0 %v848_v52 }
 0x197   : > { %1160 = vmatprep.subr.mxu0 %v1202_v1 }
 0x198   : > { %1161 = vmatpush3.msra.mxu0 %v847_v53 }
 0x1b9   : > { %s1166_s17 = spop %1165 }
 0x1ba   : > { %s957_s18 = sadd.f32 1.0, %s1166_s17 }
 0x1bc   : > { %v958_v57 = vstv %s957_s18 }
 0x1bd   : > { %1188 = vrcp.f32 %v958_v57 }
 0x1ca   : > { %v1189_v58 = vpop.eup %1188 }
 0x1cb   : > { %1167 = vpush %v1189_v58 }
 0x1fc   : > { %s1168_s25 = spop %1167 }
 0x1fd   : > { %v966_v14 = vstv %s1168_s25 }
 0x24d   : > { %v758_v48 = vpop.f32.mrf.mxu0 }
 0x24e   : > { %v759_v49 = vadd.f32 %v1071_v47, %v758_v48 }
 0x24f   : > { %v1138_v50 = vpop.f32.mrf.mxu0 }
 0x250   : > { %1148 = vmatmul.mubr.msk.f32.vlgmr.msra.gmra.mxu1 %vm491_vm1, %v759_v49 }
 0x310   : > { %v842_v60 = vpop.f32.mrf.mxu1 }
 0x311   : > { %v843_v61 = vadd.f32 %v1073_v59, %v842_v60 }
 0x312   : > { %v1149_v62 = vpop.f32.mrf.mxu1 }
 0x313   : > { %v846_v63 = vmax.f32 %v843_v61, 0.0 }
 0x315   : > { %1163 = vmatmul.mubr.msk.f32.vlgmr.msra.gmra.mxu0 %vm860_vm2, %v846_v63 }
 0x3d5   : > { %v930_v1 = vpop.f32.mrf.mxu0 }
 0x3d6   : > { %v931_v2 = vadd.f32 %v1075_v0, %v930_v1 }
 0x3d7   : > { %v1164_v3 = vpop.f32.mrf.mxu0 }
 0x3d8   : > { %v935_v4 = vsel %vm934_vm3, %v931_v2, -inf  ;;  %v967_v15 = vmul.f32 %v966_v14, %v931_v2 }
 0x3d9   : > { %936 = vmax.xlane.f32.xlu1 %v935_v4 }
 0x462   : > { %v937_v5 = vpop.xlane.xlu1 %936 }
 0x463   : > { %v938_v6 = vsub.f32 %v931_v2, %v937_v5 }
 0x465   : > { %v939_v7 = vmul.f32 1.442695, %v938_v6 }
 0x467   : > { %1190 = vpow2.f32 %v939_v7 }
 0x474   : > { %v1191_v8 = vpop.eup %1190 }
 0x475   : > { %942 = vrot.lane.b32.xlu1 %v1191_v8, %s1204_s23 }
 0x4e7   : > { %v943_v9 = vpop.permute.xlu1 %942 }
 0x4e8   : > { %v946_v10 = vsel %vm945_vm4, %v943_v9, 0.0 }
 0x4e9   : > { %947 = vadd.xlane.f32.xlu0 %v946_v10 }
 0x4ff   : > { %962 = vrot.lane.b32.xlu0 %v931_v2, %s1205_s24 }
 0x572   : > { %v948_v11 = vpop.xlane.xlu0 %947 }
 0x573   : > { %1192 = vrcp.f32 %v948_v11 }
 0x576   : > { %v963_v12 = vpop.permute.xlu0 %962 }
 0x577   : > { %v965_v13 = vsub.f32 %v931_v2, %v963_v12 }
 0x579   : > { %969 = vrot.lane.b32.xlu1 %v965_v13, %s1206_s26 }
 0x57d   : > { %973 = vrot.lane.b32.xlu1 %v967_v15, %s1207_s27 }
 0x580   : > { %v1193_v16 = vpop.eup %1192 }
 0x581   : > { %976 = vrot.lane.b32.xlu1 %v931_v2, %s1206_s26  ;;  %v950_v17 = vmul.f32 %v1193_v16, %v1191_v8 }
 0x585   : > { %980 = vrot.lane.b32.xlu1 %v950_v17, %s1208_s28 }
 0x5eb   : > { %v970_v18 = vpop.permute.xlu1 %969 }
 0x5ec   : > { %v984_v21 = vsel %vm983_vm5, %v931_v2, %v970_v18 }
 0x5ef   : > { %v974_v19 = vpop.permute.xlu1 %973 }
 0x5f0   : > { %v985_v22 = vsel %vm945_vm4, %v984_v21, %v974_v19 }
 0x5f3   : > { %v977_v20 = vpop.permute.xlu1 %976 }
 0x5f4   : > { %v987_v23 = vsel %vm986_vm6, %v985_v22, %v977_v20 }
 0x5f7   : > { %v981_v24 = vpop.permute.xlu1 %980 }
 0x5f8   : > { %v989_v25 = vsel %vm988_vm7, %v987_v23, %v981_v24 }
 0x5f9   : > { %v991_v26 = vsel %vm990_vm8, %v989_v25, 0.0 }
 0x5fa   : > { %992 = vst [vmem:[%s480_s16] sm:$0xff] %v991_v26 }
 0x5fb PF: > { %s25_s15 = sadd.s32 1, %s1200_s15  }
 0x5fc   : > { %p22_p4 = scmp.ge.s32.totalorder %s25_s15, 4  }
 0x5fe   :  { %24 = sbr.rel (!%p22_p4) target bundleno = 2 (0x2), region = 109 }

</bundles_post_ra>
